<compile_context>
chip_gen: v6e
topology: v6e:2x2x1
jax: 0.10.0
libtpu: 0.0.40
codegen_flags: <defaults>
</compile_context>

<pallas_src>
import functools
import numpy as np

import jax
import jax.numpy as jnp
from jax import lax
from jax.experimental import pallas as pl
from jax.experimental.pallas import tpu as pltpu

K_SIZE = 4
PAD = 2
LEAKY_SLOPE = 0.2
IN_EPS = 1e-5


def _round_up(x, m):
    return (x + m - 1) // m * m


def _cdiv(a, b):
    return -(-a // b)


def _chip_config():
    """Per-generation tile targets and VMEM request (perf-review items)."""
    try:
        kind = jax.devices()[0].device_kind.lower()
    except Exception:
        kind = ""
    if "v5" in kind:      # v5e/v5p: 4x128 MXU, lower ridge -> modest tiles
        return {"tm_target": 1024, "tn_max": 512, "vmem_limit": 64 * 1024 * 1024}
    if "v6" in kind:      # v6e: high ridge, 128 MiB VMEM -> big output tiles
        return {"tm_target": 2048, "tn_max": 512, "vmem_limit": 64 * 1024 * 1024}
    # v7x (and default): only 64 MiB physical VMEM -> tighter request
    return {"tm_target": 1024, "tn_max": 512, "vmem_limit": 48 * 1024 * 1024}


# ----------------------------------------------------------------------------- conv kernel

def _conv_tap_kernel(x_ref, w_ref, b_ref, o_ref, acc_ref, *,
                     taps_pp, tpp_w, wn, leaky):
    """One stride-phase of a 4x4 conv: in-kernel im2col via contiguous tap
    slices of the flattened (rows*width, Cin) activation block, accumulated
    into a f32 VMEM accumulator across the phase (reduction) grid axis."""
    p = pl.program_id(2)
    m = acc_ref.shape[0]                         # th * wn ("wide" output rows)

    @pl.when(p == 0)
    def _init():
        # bias-initialised accumulator (no bias add in the epilogue)
        acc_ref[...] = jnp.broadcast_to(b_ref[...], acc_ref.shape)

    # Reduce the taps of this phase in registers first so acc_ref is
    # read-modify-written only once per grid step.
    partial = None
    for t in range(taps_pp):
        dh, dw = divmod(t, tpp_w)
        win = x_ref[pl.ds(dh * wn + dw, m), :]                 # (m, Cin) bf16
        d = jnp.dot(win, w_ref[t], preferred_element_type=jnp.float32)
        partial = d if partial is None else partial + d
    acc_ref[...] += partial

    @pl.when(p == pl.num_programs(2) - 1)
    def _fin():
        y = acc_ref[...]
        if leaky:
            y = jnp.where(y >= 0, y, LEAKY_SLOPE * y)
        o_ref[...] = y.astype(o_ref.dtype)


def pallas_conv(x_nhwc, layer, cfg, *, leaky, last):
    """Conv2d(kernel=4, pad=2, stride s) (+ optional fused LeakyReLU).

    The padded NHWC activation (bf16) is split into s*s stride-phase planes
    (one activation-sized space-to-depth copy that replaces the 4x-16x im2col
    slab), row-chunked with a halo, flattened, and fed to the tap kernel.
    Output is lane-dense (Cout padded to a multiple of 128)."""
    w_taps, bias = layer["w_taps"], layer["bias"]
    s = layer["stride"]
    n, h, w_in, _ = x_nhwc.shape
    cin_p = layer["cin_p"]
    cout_p = w_taps.shape[-1]

    tpp_w = K_SIZE // s
    taps_pp = tpp_w * tpp_w
    halo = tpp_w - 1
    ho = (h + 2 * PAD - K_SIZE) // s + 1
    wo = (w_in + 2 * PAD - K_SIZE) // s + 1
    hn, wn = ho + halo, wo + halo

    # Channel adjust: carry 128-padded channels through the norm, slice down
    # to the 16-aligned Cin the weights were prepared for (zero pad otherwise).
    c_have = x_nhwc.shape[-1]
    if c_have > cin_p:
        x_nhwc = x_nhwc[..., :cin_p]
    elif c_have < cin_p:
        x_nhwc = jnp.pad(x_nhwc, ((0, 0), (0, 0), (0, 0), (0, cin_p - c_have)))

    # ---- tile selection (per-chip targets, VMEM budget, megacore >= 2 tiles)
    th = max(1, min(ho, max(1, cfg["tm_target"] // wn)))
    tn = 128
    for cand in (512, 256):
        if cand <= cfg["tn_max"] and cout_p % cand == 0:
            tn = cand
            break

    def _footprint(th_, tn_):
        m_ = th_ * wn
        x_b = _round_up((th_ + halo) * wn + halo, 8) * cin_p * 2
        w_b = taps_pp * cin_p * tn_ * 2
        o_b = m_ * tn_ * (4 if last else 2)
        return 2 * (x_b + w_b + tn_ * 4) + 2 * o_b + m_ * tn_ * 4 + (1 << 20)

    budget = int(cfg["vmem_limit"] * 0.6)
    while _footprint(th, tn) > budget and (th > 1 or tn > 128):
        if th > 1:
            th = max(1, th // 2)
        else:
            tn = max(128, tn // 2)

    n_chunks = _cdiv(ho, th)
    while n * n_chunks * (cout_p // tn) < 2 and tn > 128:    # keep both v7x TCs busy
        tn //= 2
    if n * n_chunks * (cout_p // tn) < 2 and ho >= 2:
        th = _cdiv(ho, 2)
        n_chunks = _cdiv(ho, th)

    th_in = th + halo
    flat_rows = th_in * wn
    padded_rows = _round_up(flat_rows + halo, 8)
    m = th * wn                                   # "wide" M (extra cols sliced off)

    # ---- phase split + row chunking (+halo) + flatten: one activation copy
    xp = jnp.pad(x_nhwc, ((0, 0), (PAD, PAD), (PAD, PAD), (0, 0)))
    planes = [xp[:, ph::s, pw::s, :][:, :hn, :wn, :]
              for ph in range(s) for pw in range(s)]
    phases = jnp.stack(planes, axis=1)            # (N, s^2, hn, wn, Cin)
    rows_needed = n_chunks * th + halo
    if rows_needed > hn:
        phases = jnp.pad(
            phases, ((0, 0), (0, 0), (0, rows_needed - hn), (0, 0), (0, 0)))
    chunks = jnp.stack([phases[:, :, c0 * th:c0 * th + th_in]
                        for c0 in range(n_chunks)], axis=1)
    xin = chunks.reshape(n, n_chunks, s * s, flat_rows, cin_p)
    xin = jnp.pad(
        xin, ((0, 0), (0, 0), (0, 0), (0, padded_rows - flat_rows), (0, 0)))
    xin = xin.reshape(n * n_chunks, s * s, padded_rows, cin_p)

    out_dtype = jnp.float32 if last else jnp.bfloat16
    grid = (n * n_chunks, cout_p // tn, s * s)

    out = pl.pallas_call(
        functools.partial(_conv_tap_kernel, taps_pp=taps_pp, tpp_w=tpp_w,
                          wn=wn, leaky=leaky),
        out_shape=jax.ShapeDtypeStruct((n * n_chunks, m, cout_p), out_dtype),
        grid_spec=pltpu.PrefetchScalarGridSpec(
            num_scalar_prefetch=0,
            grid=grid,
            in_specs=[
                pl.BlockSpec((None, None, padded_rows, cin_p),
                             lambda i, j, p: (i, p, 0, 0)),
                pl.BlockSpec((None, taps_pp, cin_p, tn),
                             lambda i, j, p: (p, 0, 0, j)),
                pl.BlockSpec((1, tn), lambda i, j, p: (0, j)),
            ],
            out_specs=pl.BlockSpec((None, m, tn), lambda i, j, p: (i, 0, j)),
            scratch_shapes=[pltpu.VMEM((m, tn), jnp.float32)],
        ),
        compiler_params=pltpu.CompilerParams(
            dimension_semantics=("parallel", "parallel", "arbitrary"),
            vmem_limit_bytes=cfg["vmem_limit"],
        ),
    )(xin, w_taps, bias)

    y = out.reshape(n, n_chunks, th, wn, cout_p)[:, :, :, :wo, :]
    y = y.reshape(n, n_chunks * th, wo, cout_p)[:, :ho]
    return y                                       # (N, Ho, Wo, Cout_padded)


# ----------------------------------------------------------------------------- instance norm

def _instnorm_leaky_fused_kernel(x_ref, o_ref):
    x = x_ref[...].astype(jnp.float32)             # (HW, TC), f32 statistics
    mean = jnp.mean(x, axis=0, keepdims=True)
    var = jnp.mean(jnp.square(x - mean), axis=0, keepdims=True)
    y = (x - mean) * lax.rsqrt(var + IN_EPS)
    o_ref[...] = jnp.where(y >= 0, y, LEAKY_SLOPE * y).astype(o_ref.dtype)


def _instnorm_stats_kernel(x_ref, mean_ref, rstd_ref, s_ref, sq_ref, *, inv_hw):
    k = pl.program_id(2)

    @pl.when(k == 0)
    def _init():
        s_ref[...] = jnp.zeros_like(s_ref)
        sq_ref[...] = jnp.zeros_like(sq_ref)

    x = x_ref[...].astype(jnp.float32)             # (THW, TC)
    s_ref[...] += jnp.sum(x, axis=0, keepdims=True)
    sq_ref[...] += jnp.sum(x * x, axis=0, keepdims=True)

    @pl.when(k == pl.num_programs(2) - 1)
    def _fin():
        mean = s_ref[...] * inv_hw
        var = jnp.maximum(sq_ref[...] * inv_hw - mean * mean, 0.0)
        mean_ref[...] = mean
        rstd_ref[...] = lax.rsqrt(var + IN_EPS)


def _instnorm_apply_kernel(x_ref, mean_ref, rstd_ref, o_ref):
    x = x_ref[...].astype(jnp.float32)
    y = (x - mean_ref[...]) * rstd_ref[...]
    o_ref[...] = jnp.where(y >= 0, y, LEAKY_SLOPE * y).astype(o_ref.dtype)


def _channel_tile(cp):
    for cand in (512, 256, 128):
        if cp % cand == 0:
            return cand
    return cp


def pallas_instnorm_leaky(x_nhwc, cfg):
    """InstanceNorm2d(affine=False) + LeakyReLU(0.2): bf16 I/O, f32 stats.

    Runs directly on the conv's 128-padded NHWC channel slab (padded channels
    stay 0).  Uses a fused one-pass kernel when the (HW, TC) slab is small,
    otherwise a streaming two-pass version that bounds VMEM for any H*W."""
    n, h, w, cp = x_nhwc.shape
    hw = h * w
    x2 = x_nhwc.reshape(n, hw, cp)
    tc = _channel_tile(cp)

    if hw * tc * 10 <= (8 << 20):                   # fused path (small slabs)
        out = pl.pallas_call(
            _instnorm_leaky_fused_kernel,
            out_shape=jax.ShapeDtypeStruct((n, hw, cp), jnp.bfloat16),
            grid_spec=pltpu.PrefetchScalarGridSpec(
                num_scalar_prefetch=0,
                grid=(n, cp // tc),
                in_specs=[pl.BlockSpec((None, hw, tc), lambda i, j: (i, 0, j))],
                out_specs=pl.BlockSpec((None, hw, tc), lambda i, j: (i, 0, j)),
            ),
            compiler_params=pltpu.CompilerParams(
                dimension_semantics=("parallel", "parallel"),
                vmem_limit_bytes=cfg["vmem_limit"]),
        )(x2)
        return out.reshape(n, h, w, cp)

    # streaming two-pass path (large H*W, e.g. v7x at realistic resolutions)
    thw = 512
    hw_p = _round_up(hw, thw)
    xs = jnp.pad(x2, ((0, 0), (0, hw_p - hw), (0, 0)))
    mean, rstd = pl.pallas_call(
        functools.partial(_instnorm_stats_kernel, inv_hw=1.0 / hw),
        out_shape=(jax.ShapeDtypeStruct((n, 1, cp), jnp.float32),
                   jax.ShapeDtypeStruct((n, 1, cp), jnp.float32)),
        grid_spec=pltpu.PrefetchScalarGridSpec(
            num_scalar_prefetch=0,
            grid=(n, cp // tc, hw_p // thw),
            in_specs=[pl.BlockSpec((None, thw, tc), lambda i, j, k: (i, k, j))],
            out_specs=(pl.BlockSpec((None, 1, tc), lambda i, j, k: (i, 0, j)),
                       pl.BlockSpec((None, 1, tc), lambda i, j, k: (i, 0, j))),
            scratch_shapes=[pltpu.VMEM((1, tc), jnp.float32),
                            pltpu.VMEM((1, tc), jnp.float32)],
        ),
        compiler_params=pltpu.CompilerParams(
            dimension_semantics=("parallel", "parallel", "arbitrary"),
            vmem_limit_bytes=cfg["vmem_limit"]),
    )(xs)
    out = pl.pallas_call(
        _instnorm_apply_kernel,
        out_shape=jax.ShapeDtypeStruct((n, hw_p, cp), jnp.bfloat16),
        grid_spec=pltpu.PrefetchScalarGridSpec(
            num_scalar_prefetch=0,
            grid=(n, cp // tc, hw_p // thw),
            in_specs=[pl.BlockSpec((None, thw, tc), lambda i, j, k: (i, k, j)),
                      pl.BlockSpec((None, 1, tc), lambda i, j, k: (i, 0, j)),
                      pl.BlockSpec((None, 1, tc), lambda i, j, k: (i, 0, j))],
            out_specs=pl.BlockSpec((None, thw, tc), lambda i, j, k: (i, k, j)),
        ),
        compiler_params=pltpu.CompilerParams(
            dimension_semantics=("parallel", "parallel", "parallel"),
            vmem_limit_bytes=cfg["vmem_limit"]),
    )(xs, mean, rstd)
    return out[:, :hw].reshape(n, h, w, cp)


# ----------------------------------------------------------------------------- parameters

def _spectral_normalize(w, key, iters=30):
    # PyTorch spectral_norm: divide the weight by its largest singular value.
    co = w.shape[0]
    wm = w.reshape(co, -1)
    u = jax.random.normal(key, (co,), dtype=jnp.float32)
    u = u / (jnp.linalg.norm(u) + 1e-12)
    for _ in range(iters):
        v = wm.T @ u
        v = v / (jnp.linalg.norm(v) + 1e-12)
        u = wm @ v
        u = u / (jnp.linalg.norm(u) + 1e-12)
    sigma = u @ (wm @ v)
    return w / sigma


def make_params(key, nf, layers_n, num_embeddings):
    """Deterministic synthetic parameters (Conv2d default init + spectral norm)."""
    specs = []
    cin = 3 + num_embeddings
    specs.append((cin, nf, 2))
    c = nf
    for i in range(1, layers_n):
        stride = 2 if i != layers_n - 1 else 1
        c_new = min(c * 2, 512)
        specs.append((c, c_new, stride))
        c = c_new
    specs.append((c, 1, 1))

    params = []
    for ci, co, s in specs:
        key, kw_, kb_, ku_ = jax.random.split(key, 4)
        fan_in = ci * K_SIZE * K_SIZE
        bound = 1.0 / np.sqrt(fan_in)
        w = jax.random.uniform(kw_, (co, ci, K_SIZE, K_SIZE),
                               minval=-bound, maxval=bound, dtype=jnp.float32)
        b = jax.random.uniform(kb_, (co,), minval=-bound, maxval=bound,
                               dtype=jnp.float32)
        w = _spectral_normalize(w, ku_)
        params.append((w, b, s))
    return params


def prepare_params(params):
    """One-time weight prep (hoisted out of the forward path): tap-major
    (phase, tap, Cin, Cout) bf16 weights with 16-aligned Cin and lane-dense
    128-padded Cout, plus the padded f32 bias."""
    prepared = []
    for w, b, stride in params:
        co, ci, _, _ = w.shape
        cin_p = _round_up(ci, 16)
        cout_p = _round_up(co, 128)
        tpp_w = K_SIZE // stride
        taps_pp = tpp_w * tpp_w
        wt = jnp.transpose(w, (2, 3, 1, 0))                 # (kh, kw, Cin, Cout)
        wt = jnp.pad(wt, ((0, 0), (0, 0), (0, cin_p - ci), (0, cout_p - co)))
        wt = wt.reshape(tpp_w, stride, tpp_w, stride, cin_p, cout_p)
        wt = jnp.transpose(wt, (1, 3, 0, 2, 4, 5))          # (ph, pw, dh, dw, ...)
        wt = wt.reshape(stride * stride, taps_pp, cin_p, cout_p)
        prepared.append({
            "w_taps": wt.astype(jnp.bfloat16),
            "bias": jnp.pad(b.astype(jnp.float32),
                            (0, cout_p - co)).reshape(1, cout_p),
            "stride": stride,
            "cin_p": cin_p,
            "cout": co,
        })
    return prepared


# ----------------------------------------------------------------------------- forward

def discriminator_forward(prepared, img_nchw, seg_nchw):
    cfg = _chip_config()
    x = jnp.concatenate([img_nchw, seg_nchw], axis=1)         # NCHW
    x = jnp.transpose(x, (0, 2, 3, 1)).astype(jnp.bfloat16)   # NHWC bf16, once
    n_layers = len(prepared)
    for i, layer in enumerate(prepared):
        first, last = i == 0, i == n_layers - 1
        y = pallas_conv(x, layer, cfg, leaky=first, last=last)
        if (not first) and (not last):
            y = pallas_instnorm_leaky(y, cfg)                 # padded channels
        x = y
    out = x[..., :prepared[-1]["cout"]]                       # drop padded Cout
    return jnp.transpose(out, (0, 3, 1, 2)).astype(jnp.float32)


# ----------------------------------------------------------------------------- reference

def reference_forward(params, img_nchw, seg_nchw):
    x = jnp.concatenate([img_nchw, seg_nchw], axis=1)
    n_layers = len(params)
    for i, (w, b, stride) in enumerate(params):
        x = lax.conv_general_dilated(
            x, w, (stride, stride), ((PAD, PAD), (PAD, PAD)),
            dimension_numbers=("NCHW", "OIHW", "NCHW")) + b[None, :, None, None]
        if i == 0:
            x = jnp.where(x >= 0, x, LEAKY_SLOPE * x)
        elif i < n_layers - 1:
            mean = jnp.mean(x, axis=(2, 3), keepdims=True)
            var = jnp.mean(jnp.square(x - mean), axis=(2, 3), keepdims=True)
            x = (x - mean) * lax.rsqrt(var + IN_EPS)
            x = jnp.where(x >= 0, x, LEAKY_SLOPE * x)
    return x


# ----------------------------------------------------------------------------- main

if __name__ == "__main__":
    key = jax.random.PRNGKey(0)
    nf, layers_n, num_embeddings = 8, 3, 4
    B, H, W = 2, 16, 16

    kp, ki, ks = jax.random.split(key, 3)
    params = make_params(kp, nf, layers_n, num_embeddings)
    prepared = prepare_params(params)

    img = jax.random.normal(ki, (B, 3, H, W), dtype=jnp.float32)
    labels = jax.random.randint(ks, (B, H, W), 0, num_embeddings)
    seg = jnp.transpose(jax.nn.one_hot(labels, num_embeddings, dtype=jnp.float32),
                        (0, 3, 1, 2))                          # (B, E, H, W)

    out = jax.block_until_ready(discriminator_forward(prepared, img, seg))
    ref = jax.block_until_ready(reference_forward(params, img, seg))
    assert out.shape == ref.shape, (out.shape, ref.shape)
    # Tolerance loosened vs the f32 XLA reference: matmul inputs AND the
    # inter-layer activations are bf16 (f32 accumulation / f32 norm stats).
    np.testing.assert_allclose(np.asarray(out), np.asarray(ref),
                               rtol=8e-2, atol=5e-2)
    print("KERNEL_OK")
</pallas_src>

<mosaic_0001>
module attributes {stable_mosaic.version = 11 : i64} {
  func.func @_conv_tap_kernel(%arg0: i32, %arg1: i32, %arg2: i32, %arg3: memref<1x1x104x16xbf16, #tpu.memory_space<vmem>>, %arg4: memref<1x4x16x128xbf16, #tpu.memory_space<vmem>>, %arg5: memref<1x128xf32, #tpu.memory_space<vmem>>, %arg6: memref<1x90x128xbf16, #tpu.memory_space<vmem>>, %arg7: memref<90x128xf32, #tpu.memory_space<vmem>>) attributes {dimension_semantics = [#tpu.dimension_semantics<parallel>, #tpu.dimension_semantics<parallel>, #tpu.dimension_semantics<arbitrary>], iteration_bounds = array<i64: 2, 1, 4>, scalar_prefetch = 0 : i64, scratch_operands = 1 : i64, tpu.core_type = #tpu.core_type<tc>, window_params = [{transform_indices = @transform_0, window_bounds = array<i64: 1, 1, 104, 16>}, {transform_indices = @transform_1, window_bounds = array<i64: 1, 4, 16, 128>}, {transform_indices = @transform_2, window_bounds = array<i64: 1, 128>}, {transform_indices = @transform_3, window_bounds = array<i64: 1, 90, 128>}]} {
    %c0_i32 = arith.constant 0 : i32
    %0 = arith.cmpi eq, %arg2, %c0_i32 : i32
    %1 = arith.extui %0 : i1 to i32
    %c0_i32_0 = arith.constant 0 : i32
    %2 = arith.cmpi ne, %1, %c0_i32_0 : i32
    scf.if %2 {
      %c0_35 = arith.constant 0 : index
      %c0_36 = arith.constant 0 : index
      %32 = vector.load %arg5[%c0_35, %c0_36] : memref<1x128xf32, #tpu.memory_space<vmem>>, vector<1x128xf32>
      %33 = vector.shape_cast %32 : vector<1x128xf32> to vector<1x128xf32>
      %34 = vector.broadcast %33 : vector<1x128xf32> to vector<90x128xf32>
      %c0_37 = arith.constant 0 : index
      %c0_38 = arith.constant 0 : index
      %35 = vector.load %arg7[%c0_37, %c0_38] : memref<90x128xf32, #tpu.memory_space<vmem>>, vector<90x128xf32>
      tpu.vector_store %arg7[%c0_37, %c0_38], %34 {strides = array<i32>} : memref<90x128xf32, #tpu.memory_space<vmem>>, vector<90x128xf32>,
    } else {
    }
    %c0 = arith.constant 0 : index
    %c0_1 = arith.constant 0 : index
    %c0_2 = arith.constant 0 : index
    %c0_3 = arith.constant 0 : index
    %3 = vector.load %arg3[%c0, %c0_1, %c0_2, %c0_3] : memref<1x1x104x16xbf16, #tpu.memory_space<vmem>>, vector<1x1x90x16xbf16>
    %4 = vector.shape_cast %3 : vector<1x1x90x16xbf16> to vector<90x16xbf16>
    %c0_4 = arith.constant 0 : index
    %c0_5 = arith.constant 0 : index
    %c0_6 = arith.constant 0 : index
    %c0_7 = arith.constant 0 : index
    %5 = vector.load %arg4[%c0_4, %c0_5, %c0_6, %c0_7] : memref<1x4x16x128xbf16, #tpu.memory_space<vmem>>, vector<1x1x16x128xbf16>
    %6 = vector.shape_cast %5 : vector<1x1x16x128xbf16> to vector<16x128xbf16>
    %cst = arith.constant dense<0.000000e+00> : vector<90x128xf32>
    %7 = tpu.matmul %4, %6, %cst {dimension_numbers = #tpu.dot_dimension_numbers<[1], [0], [0], [1], [0, 0, 1, 1], [], []>} : vector<90x16xbf16>, vector<16x128xbf16>, vector<90x128xf32> -> vector<90x128xf32>
    %c0_8 = arith.constant 0 : index
    %c0_9 = arith.constant 0 : index
    %c1 = arith.constant 1 : index
    %c0_10 = arith.constant 0 : index
    %8 = vector.load %arg3[%c0_8, %c0_9, %c1, %c0_10] : memref<1x1x104x16xbf16, #tpu.memory_space<vmem>>, vector<1x1x90x16xbf16>
    %9 = vector.shape_cast %8 : vector<1x1x90x16xbf16> to vector<90x16xbf16>
    %c0_11 = arith.constant 0 : index
    %c1_12 = arith.constant 1 : index
    %c0_13 = arith.constant 0 : index
    %c0_14 = arith.constant 0 : index
    %10 = vector.load %arg4[%c0_11, %c1_12, %c0_13, %c0_14] : memref<1x4x16x128xbf16, #tpu.memory_space<vmem>>, vector<1x1x16x128xbf16>
    %11 = vector.shape_cast %10 : vector<1x1x16x128xbf16> to vector<16x128xbf16>
    %cst_15 = arith.constant dense<0.000000e+00> : vector<90x128xf32>
    %12 = tpu.matmul %9, %11, %cst_15 {dimension_numbers = #tpu.dot_dimension_numbers<[1], [0], [0], [1], [0, 0, 1, 1], [], []>} : vector<90x16xbf16>, vector<16x128xbf16>, vector<90x128xf32> -> vector<90x128xf32>
    %13 = arith.addf %7, %12 : vector<90x128xf32>
    %c0_16 = arith.constant 0 : index
    %c0_17 = arith.constant 0 : index
    %c10 = arith.constant 10 : index
    %c0_18 = arith.constant 0 : index
    %14 = vector.load %arg3[%c0_16, %c0_17, %c10, %c0_18] : memref<1x1x104x16xbf16, #tpu.memory_space<vmem>>, vector<1x1x90x16xbf16>
    %15 = vector.shape_cast %14 : vector<1x1x90x16xbf16> to vector<90x16xbf16>
    %c0_19 = arith.constant 0 : index
    %c2 = arith.constant 2 : index
    %c0_20 = arith.constant 0 : index
    %c0_21 = arith.constant 0 : index
    %16 = vector.load %arg4[%c0_19, %c2, %c0_20, %c0_21] : memref<1x4x16x128xbf16, #tpu.memory_space<vmem>>, vector<1x1x16x128xbf16>
    %17 = vector.shape_cast %16 : vector<1x1x16x128xbf16> to vector<16x128xbf16>
    %cst_22 = arith.constant dense<0.000000e+00> : vector<90x128xf32>
    %18 = tpu.matmul %15, %17, %cst_22 {dimension_numbers = #tpu.dot_dimension_numbers<[1], [0], [0], [1], [0, 0, 1, 1], [], []>} : vector<90x16xbf16>, vector<16x128xbf16>, vector<90x128xf32> -> vector<90x128xf32>
    %19 = arith.addf %13, %18 : vector<90x128xf32>
    %c0_23 = arith.constant 0 : index
    %c0_24 = arith.constant 0 : index
    %c11 = arith.constant 11 : index
    %c0_25 = arith.constant 0 : index
    %20 = vector.load %arg3[%c0_23, %c0_24, %c11, %c0_25] : memref<1x1x104x16xbf16, #tpu.memory_space<vmem>>, vector<1x1x90x16xbf16>
    %21 = vector.shape_cast %20 : vector<1x1x90x16xbf16> to vector<90x16xbf16>
    %c0_26 = arith.constant 0 : index
    %c3 = arith.constant 3 : index
    %c0_27 = arith.constant 0 : index
    %c0_28 = arith.constant 0 : index
    %22 = vector.load %arg4[%c0_26, %c3, %c0_27, %c0_28] : memref<1x4x16x128xbf16, #tpu.memory_space<vmem>>, vector<1x1x16x128xbf16>
    %23 = vector.shape_cast %22 : vector<1x1x16x128xbf16> to vector<16x128xbf16>
    %cst_29 = arith.constant dense<0.000000e+00> : vector<90x128xf32>
    %24 = tpu.matmul %21, %23, %cst_29 {dimension_numbers = #tpu.dot_dimension_numbers<[1], [0], [0], [1], [0, 0, 1, 1], [], []>} : vector<90x16xbf16>, vector<16x128xbf16>, vector<90x128xf32> -> vector<90x128xf32>
    %25 = arith.addf %19, %24 : vector<90x128xf32>
    %c0_30 = arith.constant 0 : index
    %c0_31 = arith.constant 0 : index
    %26 = vector.load %arg7[%c0_30, %c0_31] : memref<90x128xf32, #tpu.memory_space<vmem>>, vector<90x128xf32>
    %27 = arith.addf %26, %25 : vector<90x128xf32>
    %c0_32 = arith.constant 0 : index
    %c0_33 = arith.constant 0 : index
    %28 = vector.load %arg7[%c0_32, %c0_33] : memref<90x128xf32, #tpu.memory_space<vmem>>, vector<90x128xf32>
    tpu.vector_store %arg7[%c0_32, %c0_33], %27 {strides = array<i32>} : memref<90x128xf32, #tpu.memory_space<vmem>>, vector<90x128xf32>,
    %c3_i32 = arith.constant 3 : i32
    %29 = arith.cmpi eq, %arg2, %c3_i32 : i32
    %30 = arith.extui %29 : i1 to i32
    %c0_i32_34 = arith.constant 0 : i32
    %31 = arith.cmpi ne, %30, %c0_i32_34 : i32
    scf.if %31 {
      %c0_35 = arith.constant 0 : index
      %c0_36 = arith.constant 0 : index
      %32 = vector.load %arg7[%c0_35, %c0_36] : memref<90x128xf32, #tpu.memory_space<vmem>>, vector<90x128xf32>
      %cst_37 = arith.constant 0.000000e+00 : f32
      %33 = vector.broadcast %cst_37 : f32 to vector<90x128xf32>
      %34 = arith.cmpf oge, %32, %33 : vector<90x128xf32>
      %cst_38 = arith.constant 2.000000e-01 : f32
      %35 = vector.broadcast %cst_38 : f32 to vector<90x128xf32>
      %36 = arith.mulf %35, %32 : vector<90x128xf32>
      %37 = arith.select %34, %32, %36 : vector<90x128xi1>, vector<90x128xf32>
      %38 = arith.truncf %37 : vector<90x128xf32> to vector<90x128xbf16>
      %c0_39 = arith.constant 0 : index
      %c0_40 = arith.constant 0 : index
      %c0_41 = arith.constant 0 : index
      %39 = vector.load %arg6[%c0_39, %c0_40, %c0_41] : memref<1x90x128xbf16, #tpu.memory_space<vmem>>, vector<1x90x128xbf16>
      %40 = vector.shape_cast %39 : vector<1x90x128xbf16> to vector<90x128xbf16>
      %41 = vector.shape_cast %38 : vector<90x128xbf16> to vector<1x90x128xbf16>
      tpu.vector_store %arg6[%c0_39, %c0_40, %c0_41], %41 {strides = array<i32>} : memref<1x90x128xbf16, #tpu.memory_space<vmem>>, vector<1x90x128xbf16>,
    } else {
    }
    return
  }
  func.func @transform_0(%arg0: i32, %arg1: i32, %arg2: i32) -> (i32, i32, i32, i32) {
    %c0_i32 = arith.constant 0 : i32
    %c0_i32_0 = arith.constant 0 : i32
    %c0_i32_1 = arith.constant 0 : i32
    return %arg0, %arg2, %c0_i32, %c0_i32_0 : i32, i32, i32, i32
  }
  func.func @transform_1(%arg0: i32, %arg1: i32, %arg2: i32) -> (i32, i32, i32, i32) {
    %c0_i32 = arith.constant 0 : i32
    %c0_i32_0 = arith.constant 0 : i32
    %c0_i32_1 = arith.constant 0 : i32
    return %arg2, %c0_i32, %c0_i32_0, %arg1 : i32, i32, i32, i32
  }
  func.func @transform_2(%arg0: i32, %arg1: i32, %arg2: i32) -> (i32, i32) {
    %c0_i32 = arith.constant 0 : i32
    %c0_i32_0 = arith.constant 0 : i32
    return %c0_i32, %arg1 : i32, i32
  }
  func.func @transform_3(%arg0: i32, %arg1: i32, %arg2: i32) -> (i32, i32, i32) {
    %c0_i32 = arith.constant 0 : i32
    %c0_i32_0 = arith.constant 0 : i32
    return %arg0, %c0_i32, %arg1 : i32, i32, i32
  }
}

</mosaic_0001>

<bundles_post_ra>
// kernel: tpu_custom_call.1
= control target key start
LH: loop header
LB: loop body
LE: loop exit
PB: predicated region body
PF: predicated region fallthrough
CT: control target
= control target key end

     0   :  { %s1531_s12 = smov 0   ;;  %s1533_s13 = smov 0   ;;  %s1698_s0 = inlined_call_operand.vmem [shape: bf16[2,4,104,16], index: 0, kind: input, shape index: {}]   ;;  %s1699_s1 = inlined_call_operand.vmem [shape: bf16[4,4,16,128], index: 1, kind: input, shape index: {}]   ;;  %s1700_s2 = inlined_call_operand.vmem [shape: f32[1,128], index: 2, kind: input, shape index: {}]   ;;  %s1701_s3 = inlined_call_operand.vmem [shape: bf16[2,90,128], index: 3, kind: output, shape index: {}]  }
   0x1   :  { %s1535_s14 = smov 0   ;;  %s1537_s15 = smov 0  }
   0x2   :  { %s1539_s16 = smov 0  }
   0x3 LB: > { %s25_s17 = sadd.s32 1, %s1501_s14  ;;  %s32_s18 = sadd.s32 1, %s1505_s15  ;;  %s1509_s16 = sphi %s1539_s16, %s13_s16   ;;  %s1505_s15 = sphi %s1537_s15, %s1705_s15   ;;  %s1501_s14 = sphi %s1535_s14, %s1704_s14   ;;  %s1497_s13 = sphi %s1533_s13, %s1703_s13   ;;  %s1493_s12 = sphi %s1531_s12, %s1702_s12  }
   0x4   : > { %p26_p0 = scmp.ge.s32.totalorder %s25_s17, 4  ;;  %p1214_p1 = scmp.ge.s32.totalorder %s1509_s16, 1 }
   0x5   : > { %p187_p2 = scmp.lt.s32.totalorder %s1509_s16, 9 }
   0x6   : > { %s1707_s17 = smov (%p26_p0, %s25_s17), 0  ;;  %s1709_s18 = smov (!%p26_p0, %s32_s18), %s1505_s15 }
   0x7   : > { %p188_p3 = pnand %p1214_p1, %p187_p2  ;;  %p34_p4 = scmp.ge.s32.totalorder %s1709_s18, 2 }
   0x8   : > { %p229_p5 = scmp.lt.s32.totalorder (!%p188_p3), %s1497_s13, 1  ;;  %p231_p6 = scmp.lt.s32.totalorder (!%p188_p3), %s1493_s12, 3 }
   0x9   : > { %s1711_s18 = smov (%p34_p4, %s1709_s18), 0  ;;  %191 = sbr.rel (%p188_p3) target bundleno = 303 (0x12f), region = 32 }
   0xa   : > { %p1219_p7 = scmp.ne.s32.totalorder (!%p188_p3), %s1493_s12, 0 }
   0xe   : > { %s1713_s13 = smov (!%p229_p5, %s1497_s13), 1 }
   0xf   : > { %s232_s19 = scalar_select %p231_p6, %s1493_s12, 3 }
  0x10   : > { %s1411_s20 = smul.u32 52, %s1713_s13 }
  0x11   : > { %s1410_s21 = smul.u32 13, %s232_s19  ;;  %s1284_s22 = sshll.u32 %s232_s19, 5 }
  0x12   : > { %s1568_s25 = scalar_lea.vmem %s1699_s1, %s1284_s22  ;;  %s1412_s26 = smul.u32 48, %s1713_s13 }
  0x13   : > { %s235_s27 = sadd.s32 %s1411_s20, %s1410_s21  ;;  %261 = sbr.rel (%p1219_p7) target bundleno = 31 (0x1f), region = 36 }
  0x14   : > { %s1215_s28 = sshll.u32 %s235_s27, 2  ;;  %s1573_s4 = scalar_lea.vmem %s1701_s3, %s1412_s26 }
  0x15   : > { %s1578_s7 = scalar_lea.vmem %s1698_s0, %s1215_s28 }
  0x18   : > { %v1220_v0 = vld [vmem:[%s1700_s2] ss:$0 sm:$0xff] }
  0x19   : > { %269 = vst [vmem:[#allocation2 + $0x30] sm:$0xff] %v1220_v0  ;;  %270 = vst [vmem:[#allocation2] sm:$0xff] %v1220_v0 }
  0x1a   : > { %271 = vst [vmem:[#allocation2 + $0x58] sm:$0xff] %v1220_v0  ;;  %272 = vst [vmem:[#allocation2 + $0x18] sm:$0xff] %v1220_v0 }
  0x1b   : > { %273 = vst [vmem:[#allocation2 + $0x50] sm:$0xff] %v1220_v0  ;;  %274 = vst [vmem:[#allocation2 + $0x20] sm:$0xff] %v1220_v0 }
  0x1c   : > { %275 = vst [vmem:[#allocation2 + $0x8] sm:$0xff] %v1220_v0  ;;  %276 = vst [vmem:[#allocation2 + $0x38] sm:$0xff] %v1220_v0 }
  0x1d   : > { %277 = vst [vmem:[#allocation2 + $0x28] sm:$0xff] %v1220_v0  ;;  %278 = vst [vmem:[#allocation2 + $0x48] sm:$0xff] %v1220_v0 }
  0x1e   : > { %279 = vst [vmem:[#allocation2 + $0x10] sm:$0xff] %v1220_v0  ;;  %280 = vst [vmem:[#allocation2 + $0x40] sm:$0x3] %v1220_v0 }
  0x1f PF: > { %v1453_v1 = vld [vmem:[%s1568_s25] sm:$0xff]   ;;  %v1454_v2 = vld [vmem:[%s1568_s25 + $0x8] sm:$0xff]   ;;  %vm383_vm0 = vcmask 130048   ;;  %vm329_vm1 = vsmask.f32 7424  ;;  %v1457_v9 = vld [vmem:[%s1568_s25 + $0x10] sm:$0xff]  }
  0x20   : > { %1368 = vmatprep.subr.bf16.mxu1 %v1453_v1  ;;  %v1455_v3 = vld [vmem:[%s1578_s7] sm:$0xff]   ;;  %1354 = vmatprep.subr.bf16.mxu0 %v1454_v2  ;;  %v1456_v4 = vld [vmem:[%s1578_s7 + $0x8] sm:$0xff]   ;;  %v1458_v10 = vld [vmem:[%s1578_s7 + $0x10] sm:$0xff]   ;;  %vm767_vm2 = vsmask.f32 6400  ;;  %vm631_vm3 = vcmask 1046528  }
  0x21   : > { %1369 = vmatpush3.bf16.msra.mxu1 %v1453_v1  ;;  %1370 = vmatprep.mubr.msk.bf16.mxu1 %vm383_vm0, %v1455_v3  ;;  %v331_v5 = vshrl.u32 %v1455_v3, 16  ;;  %v333_v6 = vshll.u32 %v1455_v3, 16  ;;  %v338_v7 = vshll.u32 %v1456_v4, 16  ;;  %v342_v8 = vshrl.u32 %v1456_v4, 16  ;;  %v1459_v12 = vld [vmem:[%s1568_s25 + $0x18] sm:$0xff]   ;;  %v1461_v20 = vld [vmem:[%s1578_s7 + $0x20] sm:$0xff]  }
  0x22   : > { %1355 = vmatpush3.bf16.msra.mxu0 %v1454_v2  ;;  %v346_v14 = vshll.u32 %v1458_v10, 16  ;;  %1396 = vmatprep.subr.bf16.mxu1 %v1459_v12  ;;  %v1460_v16 = vld [vmem:[%s1578_s7 + $0x18] sm:$0xff]   ;;  %v350_v17 = vshrl.u32 %v1458_v10, 16  ;;  %v291_v24 = vld [vmem:[%s1578_s7 + $0x28] sm:$0xf]  ;;  %v362_v27 = vshll.u32 %v1461_v20, 16 }
  0x23   : > { %v335_v11 = vrot.slane %v333_v6, 1  ;;  %v340_v13 = vrot.slane %v338_v7, 1  ;;  %1382 = vmatprep.subr.bf16.mxu0 %v1457_v9  ;;  %v354_v22 = vshll.u32 %v1460_v16, 16  ;;  %v358_v23 = vshrl.u32 %v1460_v16, 16  ;;  %v295_v28 = vld [vmem:[%s1578_s7 + $0x2c] sm:$0x3] }
  0x24   : > { %1371 = vmatmul.mubr.msk.bf16.vlgmr.msra.gmra.mxu1 %vm383_vm0, %v1456_v4  ;;  %v348_v19 = vrot.slane %v346_v14, 1  ;;  %v1602_v29 = vld [vmem:[%s1578_s7 + $0xc] sm:$0xff]   ;;  %v1228_v31 = vcombine.low %v291_v24, %v295_v28  ;;  %v366_v32 = vshrl.u32 %v1461_v20, 16  ;;  %v364_v33 = vrot.slane %v362_v27, 1  ;;  %v1464_v34 = vld [vmem:[%s1578_s7 + $0x4] sm:$0xfe]  }
  0x25   : > { %1374 = vmatprep.mubr.msk.bf16.mxu1 %vm383_vm0, %v1458_v10  ;;  %v336_v15 = vor.u32 %v335_v11, %v331_v5  ;;  %v344_v18 = vor.u32 %v342_v8, %v340_v13  ;;  %1397 = vmatpush3.bf16.msra.mxu1 %v1459_v12  ;;  %v356_v30 = vrot.slane %v354_v22, 1  ;;  %v777_v35 = vshrl.u32 %v1602_v29, 16  ;;  %v292_v39 = vld [vmem:[%s1578_s7 + $0x2c] sm:$0x1]  ;;  %v1466_v43 = vld [vmem:[%s1578_s7 + $0x14] sm:$0xff]   ;;  %v1616_v48 = vld [vmem:[%s1578_s7 + $0x1c] sm:$0xff]  }
  0x26   : > { %v352_v26 = vor.u32 %v350_v17, %v348_v19  ;;  %v370_v38 = vshll.u32 %v1228_v31, 16  ;;  %v368_v40 = vor.u32 %v366_v32, %v364_v33  ;;  %v769_v41 = vshrl.u32 %v1464_v34, 16  ;;  %v1468_v59 = vld [vmem:[%s1578_s7 + $0x24] sm:$0xff]   ;;  %v596_v1 = vld [vmem:[%s1578_s7 + $0x2c] sm:$0xf]  ;;  %p1269_p8 = scmp.ne.s32.totalorder %s1493_s12, 3 }
  0x27   : > { %v341_v21 = vsel %vm329_vm1, %v336_v15, %v340_v13  ;;  %v349_v25 = vsel %vm329_vm1, %v344_v18, %v348_v19  ;;  %v360_v37 = vor.u32 %v358_v23, %v356_v30  ;;  %v772_v42 = vshll.u32 %v1464_v34, 16  ;;  %v760_v2 = vld [vmem:[%s1578_s7 + $0x30] sm:$0x7] }
  0x28   : > { %1356 = vmatprep.mubr.msk.bf16.mxu0 %vm383_vm0, %v341_v21  ;;  %v357_v36 = vsel %vm329_vm1, %v352_v26, %v356_v30  ;;  %v372_v45 = vrot.slane %v370_v38, 1  ;;  %v779_v46 = vrot.slane %v777_v35, 1  ;;  %v780_v47 = vshll.u32 %v1602_v29, 16 }
  0x29   : > { %1357 = vmatmul.mubr.msk.bf16.vlgmr.msra.gmra.mxu0 %vm383_vm0, %v349_v25  ;;  %v365_v44 = vsel %vm329_vm1, %v360_v37, %v364_v33  ;;  %v771_v49 = vrot.slane %v769_v41, 1  ;;  %v774_v50 = vrot.slane %v772_v42, 2  ;;  %v786_v51 = vshrl.u32 %v1466_v43, 16  ;;  %v597_v25 = vld [vmem:[%s1578_s7 + $0x30] sm:$0x3] }
  0x2a   : > { %1383 = vmatpush3.bf16.msra.mxu0 %v1457_v9  ;;  %1360 = vmatprep.mubr.msk.bf16.mxu0 %vm383_vm0, %v357_v36  ;;  %v789_v52 = vshll.u32 %v1466_v43, 16  ;;  %v1236_v53 = vcombine.low %v291_v24, %v292_v39  ;;  %v373_v54 = vsel %vm329_vm1, %v368_v40, %v372_v45  ;;  %v782_v55 = vrot.slane %v780_v47, 2 }
  0x2b   : > { %v775_v56 = vor.u32 %v774_v50, %v771_v49  ;;  %v788_v57 = vrot.slane %v786_v51, 1  ;;  %v374_v60 = vshrl.u32 %v1228_v31, 16  ;;  %v795_v62 = vshrl.u32 %v1616_v48, 16 }
  0x2c   : > { %1375 = vmatmul.mubr.msk.bf16.gmra.mxu1 %vm383_vm0, %v1460_v16  ;;  %v791_v58 = vrot.slane %v789_v52, 2  ;;  %v783_v61 = vor.u32 %v782_v55, %v779_v46  ;;  %v798_v63 = vshll.u32 %v1616_v48, 16  ;;  %v632_v0 = vrot.slane %v1464_v34, 1 }
  0x2d   : > { %1378 = vmatprep.mubr.msk.bf16.mxu1 %vm383_vm0, %v1461_v20  ;;  %v633_v4 = vrot.slane %v1602_v29, 1  ;;  %v797_v5 = vrot.slane %v795_v62, 1  ;;  %v804_v8 = vshrl.u32 %v1468_v59, 16  ;;  %v807_v9 = vshll.u32 %v1468_v59, 16 }
  0x2e   : > { %v784_v3 = vsel %vm767_vm2, %v775_v56, %v783_v61  ;;  %v800_v6 = vrot.slane %v798_v63, 2  ;;  %v792_v7 = vor.u32 %v791_v58, %v788_v57  ;;  %v376_v10 = vor.u32 %v374_v60, %v372_v45 }
  0x2f   : > { %v1261_v12 = vcombine.low %v596_v1, %v760_v2  ;;  %v634_v13 = vsel %vm631_vm3, %v632_v0, %v633_v4  ;;  %v806_v17 = vrot.slane %v804_v8, 1  ;;  %v809_v18 = vrot.slane %v807_v9, 2 }
  0x30   : > { %v801_v11 = vor.u32 %v800_v6, %v797_v5  ;;  %v793_v16 = vsel %vm767_vm2, %v783_v61, %v792_v7  ;;  %v635_v22 = vrot.slane %v1466_v43, 1  ;;  %v637_v23 = vrot.slane %v1616_v48, 1 }
  0x31   : > { %1361 = vmatmul.mubr.msk.bf16.gmra.mxu0 %vm383_vm0, %v365_v44  ;;  %v813_v14 = vshrl.u32 %v1261_v12, 16  ;;  %v816_v15 = vshll.u32 %v1261_v12, 16  ;;  %v810_v24 = vor.u32 %v809_v18, %v806_v17  ;;  %v1251_v29 = vcombine.low %v596_v1, %v597_v25  ;;  %v941_v17 = vld [vmem:[#allocation2 + $0x18] sm:$0xff] }
  0x32   : > { %1364 = vmatprep.mubr.msk.bf16.mxu0 %vm383_vm0, %v373_v54  ;;  %v802_v19 = vsel %vm767_vm2, %v792_v7, %v801_v11  ;;  %v636_v27 = vsel %vm631_vm3, %v633_v4, %v635_v22  ;;  %v638_v28 = vsel %vm631_vm3, %v635_v22, %v637_v23  ;;  %v639_v32 = vrot.slane %v1468_v59, 1  ;;  %v940_v4 = vld [vmem:[#allocation2 + $0x58] sm:$0xff] }
  0x33   : > { %v815_v20 = vrot.slane %v813_v14, 1  ;;  %v818_v21 = vrot.slane %v816_v15, 2  ;;  %v811_v30 = vsel %vm767_vm2, %v801_v11, %v810_v24  ;;  %v641_v33 = vrot.slane %v1251_v29, 1 }
  0x34   : > { %1379 = vmatmul.mubr.msk.bf16.gmra.mxu1 %vm383_vm0, %v1236_v53  ;;  %v640_v34 = vsel %vm631_vm3, %v637_v23, %v639_v32 }
  0x35   : > { %1398 = vmatprep.mubr.msk.bf16.mxu1 %vm383_vm0, %v784_v3  ;;  %v819_v26 = vor.u32 %v818_v21, %v815_v20  ;;  %v642_v35 = vsel %vm631_vm3, %v639_v32, %v641_v33 }
  0x37   : > { %v820_v31 = vsel %vm767_vm2, %v810_v24, %v819_v26  ;;  %v939_v24 = vld [vmem:[#allocation2] sm:$0xff] }
  0x39   : > { %1365 = vmatmul.mubr.msk.bf16.gmra.mxu0 %vm383_vm0, %v376_v10  ;;  %v938_v10 = vld [vmem:[#allocation2 + $0x30] sm:$0xff] }
  0x3a   : > { %1384 = vmatprep.mubr.msk.bf16.mxu0 %vm383_vm0, %v634_v13 }
  0x3c   : > { %1399 = vmatmul.mubr.msk.bf16.vlgmr.msra.gmra.mxu1 %vm383_vm0, %v793_v16 }
  0x3d   : > { %1402 = vmatprep.mubr.msk.bf16.mxu1 %vm383_vm0, %v802_v19 }
  0x41   : > { %1385 = vmatmul.mubr.msk.bf16.vlgmr.msra.gmra.mxu0 %vm383_vm0, %v636_v27 }
  0x42   : > { %1388 = vmatprep.mubr.msk.bf16.mxu0 %vm383_vm0, %v638_v28 }
  0x44   : > { %1403 = vmatmul.mubr.msk.bf16.gmra.mxu1 %vm383_vm0, %v811_v30 }
  0x45   : > { %1406 = vmatprep.mubr.msk.bf16.mxu1 %vm383_vm0, %v820_v31  ;;  %v944_v31 = vld [vmem:[#allocation2 + $0x8] sm:$0xff] }
  0x49   : > { %1389 = vmatmul.mubr.msk.bf16.gmra.mxu0 %vm383_vm0, %v640_v34 }
  0x4a   : > { %1392 = vmatprep.mubr.msk.bf16.mxu0 %vm383_vm0, %v642_v35 }
  0x4c   : > { %1407 = vmatmul.mubr.msk.bf16.gmra.mxu1 %vm383_vm0, %v819_v26 }
  0x51   : > { %1393 = vmatmul.mubr.msk.bf16.gmra.mxu0 %vm383_vm0, %v641_v33 }
  0xe4   : > { %v1372_v36 = vpop.f32.mrf.mxu1 }
  0xe6   : > { %v539_v37 = vpop.f32.mrf.mxu1 }
  0xe8   : > { %v1373_v38 = vpop.f32.mrf.mxu1 }
  0xe9   : > { %v1358_v39 = vpop.f32.mrf.mxu0 }
  0xea   : > { %v542_v40 = vpop.f32.mrf.mxu1  ;;  %v548_v63 = vadd.f32 %v1372_v36, %v1358_v39 }
  0xeb   : > { %v436_v41 = vpop.f32.mrf.mxu0 }
  0xec   : > { %v1376_v42 = vpop.f32.mrf.mxu1  ;;  %v540_v2 = vadd.f32 %v539_v37, %v436_v41  ;;  %v942_v37 = vld [vmem:[#allocation2 + $0x50] sm:$0xff] }
  0xed   : > { %v1359_v43 = vpop.f32.mrf.mxu0 }
  0xee   : > { %v555_v44 = vpop.f32.mrf.mxu1  ;;  %v551_v7 = vadd.f32 %v1373_v38, %v1359_v43 }
  0xef   : > { %v439_v45 = vpop.f32.mrf.mxu0 }
  0xf0   : > { %v1377_v46 = vpop.f32.mrf.mxu1  ;;  %v543_v13 = vadd.f32 %v542_v40, %v439_v45 }
  0xf1   : > { %v1362_v47 = vpop.f32.mrf.mxu0 }
  0xf2   : > { %v558_v48 = vpop.f32.mrf.mxu1  ;;  %v564_v20 = vadd.f32 %v1376_v42, %v1362_v47 }
  0xf3   : > { %v452_v49 = vpop.f32.mrf.mxu0 }
  0xf4   : > { %v1653_v50 = vpop.f32.mrf.mxu1  ;;  %v556_v27 = vadd.f32 %v555_v44, %v452_v49  ;;  %v945_v44 = vld [vmem:[#allocation2 + $0x38] sm:$0xff] }
  0xf5   : > { %v1363_v51 = vpop.f32.mrf.mxu0 }
  0xf6   : > { %v1655_v52 = vpop.f32.mrf.mxu1  ;;  %v567_v33 = vadd.f32 %v1377_v46, %v1363_v51  ;;  %v943_v51 = vld [vmem:[#allocation2 + $0x20] sm:$0xff] }
  0xf7   : > { %v455_v53 = vpop.f32.mrf.mxu0 }
  0xf8   : > { %v1657_v54 = vpop.f32.mrf.mxu1  ;;  %v559_v40 = vadd.f32 %v558_v48, %v455_v53 }
  0xf9   : > { %v1366_v55 = vpop.f32.mrf.mxu0 }
  0xfa   : > { %v1659_v56 = vpop.f32.mrf.mxu1  ;;  %v580_v47 = vadd.f32 %v1653_v50, %v1366_v55 }
  0xfb   : > { %v1661_v57 = vpop.f32.mrf.mxu0 }
  0xfc   : > { %v1400_v58 = vpop.f32.mrf.mxu1 }
  0xfd   : > { %v1663_v59 = vpop.f32.mrf.mxu0 }
  0xfe   : > { %v879_v60 = vpop.f32.mrf.mxu1 }
  0xff   : > { %v1665_v61 = vpop.f32.mrf.mxu0 }
 0x100   : > { %v1401_v62 = vpop.f32.mrf.mxu1 }
 0x101   : > { %v1386_v0 = vpop.f32.mrf.mxu0 }
 0x102   : > { %v882_v1 = vpop.f32.mrf.mxu1  ;;  %v750_v3 = vadd.f32 %v1386_v0, %v548_v63  ;;  %v572_v63 = vadd.f32 %v1655_v52, %v1661_v57 }
 0x103   : > { %v701_v5 = vpop.f32.mrf.mxu0 }
 0x104   : > { %v1404_v6 = vpop.f32.mrf.mxu1  ;;  %v928_v8 = vadd.f32 %v1400_v58, %v750_v3  ;;  %v748_v9 = vadd.f32 %v701_v5, %v540_v2  ;;  %v583_v3 = vadd.f32 %v1657_v54, %v1663_v59 }
 0x105   : > { %v1387_v11 = vpop.f32.mrf.mxu0 }
 0x106   : > { %v895_v12 = vpop.f32.mrf.mxu1  ;;  %v952_v14 = vadd.f32 %v940_v4, %v928_v8  ;;  %v926_v15 = vadd.f32 %v879_v60, %v748_v9  ;;  %v751_v16 = vadd.f32 %v1387_v11, %v551_v7  ;;  %v575_v8 = vadd.f32 %v1659_v56, %v1665_v61 }
 0x107   : > { %v704_v18 = vpop.f32.mrf.mxu0 }
 0x108   : > { %v1405_v19 = vpop.f32.mrf.mxu1  ;;  %964 = vst [vmem:[#allocation2 + $0x58] sm:$0xff] %v952_v14  ;;  %v950_v21 = vadd.f32 %v938_v10, %v926_v15  ;;  %v929_v22 = vadd.f32 %v1401_v62, %v751_v16  ;;  %v749_v23 = vadd.f32 %v704_v18, %v543_v13  ;;  %v949_v10 = vld [vmem:[#allocation2 + $0x40] sm:$0x3]  ;;  %v947_v14 = vld [vmem:[#allocation2 + $0x48] sm:$0xff] }
 0x109   : > { %v1390_v25 = vpop.f32.mrf.mxu0 }
 0x10a   : > { %v898_v26 = vpop.f32.mrf.mxu1  ;;  %962 = vst [vmem:[#allocation2 + $0x30] sm:$0xff] %v950_v21  ;;  %v953_v28 = vadd.f32 %v941_v17, %v929_v22  ;;  %v927_v29 = vadd.f32 %v882_v1, %v749_v23  ;;  %v754_v30 = vadd.f32 %v1390_v25, %v564_v20  ;;  %v948_v1 = vld [vmem:[#allocation2 + $0x10] sm:$0xff] }
 0x10b   : > { %v717_v32 = vpop.f32.mrf.mxu0 }
 0x10c   : > { %965 = vst [vmem:[#allocation2 + $0x18] sm:$0xff] %v953_v28  ;;  %v951_v34 = vadd.f32 %v939_v24, %v927_v29  ;;  %v932_v35 = vadd.f32 %v1404_v6, %v754_v30  ;;  %v752_v36 = vadd.f32 %v717_v32, %v556_v27  ;;  %v1408_v39 = vpop.f32.mrf.mxu1  ;;  %v946_v6 = vld [vmem:[#allocation2 + $0x28] sm:$0xff] }
 0x10d   : > { %v1391_v38 = vpop.f32.mrf.mxu0 }
 0x10e   : > { %963 = vst [vmem:[#allocation2] sm:$0xff] %v951_v34  ;;  %v956_v41 = vadd.f32 %v944_v31, %v932_v35  ;;  %v930_v42 = vadd.f32 %v895_v12, %v752_v36  ;;  %v755_v43 = vadd.f32 %v1391_v38, %v567_v33  ;;  %v911_v60 = vpop.f32.mrf.mxu1 }
 0x10f   : > { %v720_v45 = vpop.f32.mrf.mxu0 }
 0x110   : > { %968 = vst [vmem:[#allocation2 + $0x8] sm:$0xff] %v956_v41  ;;  %v954_v49 = vadd.f32 %v942_v37, %v930_v42  ;;  %v933_v58 = vadd.f32 %v1405_v19, %v755_v43  ;;  %v753_v46 = vadd.f32 %v720_v45, %v559_v40  ;;  %v1409_v5 = vpop.f32.mrf.mxu1 }
 0x111   : > { %v1394_v62 = vpop.f32.mrf.mxu0 }
 0x112   : > { %966 = vst [vmem:[#allocation2 + $0x50] sm:$0xff] %v954_v49  ;;  %v957_v48 = vadd.f32 %v945_v44, %v933_v58  ;;  %v931_v53 = vadd.f32 %v898_v26, %v753_v46  ;;  %v758_v0 = vadd.f32 %v1394_v62, %v580_v47  ;;  %v914_v59 = vpop.f32.mrf.mxu1 }
 0x113   : > { %v733_v2 = vpop.f32.mrf.mxu0 }
 0x114   : > { %969 = vst [vmem:[#allocation2 + $0x38] sm:$0xff] %v957_v48  ;;  %v955_v50 = vadd.f32 %v943_v51, %v931_v53  ;;  %v936_v55 = vadd.f32 %v1408_v39, %v758_v0  ;;  %v756_v4 = vadd.f32 %v733_v2, %v572_v63 }
 0x115   : > { %v1395_v7 = vpop.f32.mrf.mxu0 }
 0x116   : > { %967 = vst [vmem:[#allocation2 + $0x20] sm:$0xff] %v955_v50  ;;  %v960_v52 = vadd.f32 %v948_v1, %v936_v55  ;;  %v934_v57 = vadd.f32 %v911_v60, %v756_v4  ;;  %v759_v9 = vadd.f32 %v1395_v7, %v583_v3 }
 0x117   : > { %v736_v11 = vpop.f32.mrf.mxu0 }
 0x118   : > { %972 = vst [vmem:[#allocation2 + $0x10] sm:$0xff] %v960_v52  ;;  %v958_v12 = vadd.f32 %v946_v6, %v934_v57  ;;  %v937_v13 = vadd.f32 %v1409_v5, %v759_v9  ;;  %v757_v54 = vadd.f32 %v736_v11, %v575_v8 }
 0x11a   : > { %970 = vst [vmem:[#allocation2 + $0x28] sm:$0xff] %v958_v12  ;;  %v961_v15 = vadd.f32 %v949_v10, %v937_v13  ;;  %v935_v16 = vadd.f32 %v914_v59, %v757_v54  ;;  %977 = sbr.rel (%p1269_p8) target bundleno = 303 (0x12f), region = 40 }
 0x11c   : > { %973 = vst [vmem:[#allocation2 + $0x40] sm:$0x3] %v961_v15  ;;  %v959_v17 = vadd.f32 %v947_v14, %v935_v16 }
 0x11e   : > { %971 = vst [vmem:[#allocation2 + $0x48] sm:$0xff] %v959_v17 }
 0x11f   : > { %v978_v56 = vld [vmem:[#allocation2 + $0x30] sm:$0xff]  ;;  %v979_v61 = vld [vmem:[#allocation2] sm:$0xff]  ;;  %v980_v18 = vld [vmem:[#allocation2 + $0x58] sm:$0xff] }
 0x120   : > { %vm990_vm4 = vcmp.ge.f32.partialorder %v978_v56, 0.0  ;;  %vm991_vm5 = vcmp.ge.f32.partialorder %v979_v61, 0.0  ;;  %v1002_v19 = vmul.f32 0.2, %v978_v56  ;;  %v1003_v20 = vmul.f32 0.2, %v979_v61 }
 0x121   : > { %v981_v21 = vld [vmem:[#allocation2 + $0x18] sm:$0xff]  ;;  %vm992_vm6 = vcmp.ge.f32.partialorder %v980_v18, 0.0  ;;  %v1004_v22 = vmul.f32 0.2, %v980_v18  ;;  %v982_v23 = vld [vmem:[#allocation2 + $0x50] sm:$0xff]  ;;  %v983_v24 = vld [vmem:[#allocation2 + $0x20] sm:$0xff] }
 0x122   : > { %v1014_v25 = vsel %vm990_vm4, %v978_v56, %v1002_v19  ;;  %v1015_v26 = vsel %vm991_vm5, %v979_v61, %v1003_v20  ;;  %vm993_vm7 = vcmp.ge.f32.partialorder %v981_v21, 0.0  ;;  %v1005_v27 = vmul.f32 0.2, %v981_v21  ;;  %v984_v28 = vld [vmem:[#allocation2 + $0x8] sm:$0xff]  ;;  %v985_v29 = vld [vmem:[#allocation2 + $0x38] sm:$0xff]  ;;  %v988_v40 = vld [vmem:[#allocation2 + $0x10] sm:$0xff] }
 0x123   : > { %v1300_v30 = vpack.c.bf16 %v1015_v26, %v1014_v25  ;;  %v1016_v31 = vsel %vm992_vm6, %v980_v18, %v1004_v22  ;;  %vm994_vm8 = vcmp.ge.f32.partialorder %v982_v23, 0.0  ;;  %vm995_vm9 = vcmp.ge.f32.partialorder %v983_v24, 0.0  ;;  %v986_v32 = vld [vmem:[#allocation2 + $0x28] sm:$0xff]  ;;  %v989_v43 = vld [vmem:[#allocation2 + $0x40] sm:$0x3] }
 0x124   : > { %v1017_v34 = vsel %vm993_vm7, %v981_v21, %v1005_v27  ;;  %v1006_v35 = vmul.f32 0.2, %v982_v23  ;;  %v1007_v36 = vmul.f32 0.2, %v983_v24  ;;  %vm996_vm10 = vcmp.ge.f32.partialorder %v984_v28, 0.0 }
 0x125   : > { %v987_v33 = vld [vmem:[#allocation2 + $0x48] sm:$0xff]  ;;  %1301 = vst [vmem:[%s1573_s4] sm:$0xff] %v1300_v30   ;;  %v1305_v37 = vpack.c.bf16 %v1017_v34, %v1016_v31  ;;  %vm997_vm11 = vcmp.ge.f32.partialorder %v985_v29, 0.0  ;;  %v1008_v38 = vmul.f32 0.2, %v984_v28  ;;  %v1009_v39 = vmul.f32 0.2, %v985_v29 }
 0x126   : > { %v1018_v41 = vsel %vm994_vm8, %v982_v23, %v1006_v35  ;;  %v1019_v42 = vsel %vm995_vm9, %v983_v24, %v1007_v36  ;;  %vm998_vm12 = vcmp.ge.f32.partialorder %v986_v32, 0.0  ;;  %vm999_vm13 = vcmp.ge.f32.partialorder %v987_v33, 0.0 }
 0x127   : > { %1322 = vst [vmem:[%s1573_s4 + $0x8] sm:$0xff] %v1305_v37   ;;  %v1310_v44 = vpack.c.bf16 %v1019_v42, %v1018_v41  ;;  %v1020_v45 = vsel %vm996_vm10, %v984_v28, %v1008_v38  ;;  %v1021_v47 = vsel %vm997_vm11, %v985_v29, %v1009_v39  ;;  %v1010_v49 = vmul.f32 0.2, %v986_v32 }
 0x128   : > { %v1315_v58 = vpack.c.bf16 %v1021_v47, %v1020_v45  ;;  %v1011_v46 = vmul.f32 0.2, %v987_v33  ;;  %vm1000_vm14 = vcmp.ge.f32.partialorder %v988_v40, 0.0  ;;  %v1012_v51 = vmul.f32 0.2, %v988_v40 }
 0x129   : > { %1323 = vst [vmem:[%s1573_s4 + $0x10] sm:$0xff] %v1310_v44   ;;  %v1022_v60 = vsel %vm998_vm12, %v986_v32, %v1010_v49  ;;  %vm1001_vm15 = vcmp.ge.f32.partialorder %v989_v43, 0.0  ;;  %v1013_v62 = vmul.f32 0.2, %v989_v43 }
 0x12a   : > { %1324 = vst [vmem:[%s1573_s4 + $0x18] sm:$0xff] %v1315_v58   ;;  %v1023_v63 = vsel %vm999_vm13, %v987_v33, %v1011_v46  ;;  %v1024_v48 = vsel %vm1000_vm14, %v988_v40, %v1012_v51 }
 0x12b   : > { %v1320_v53 = vpack.c.bf16 %v1023_v63, %v1022_v60  ;;  %v1295_v0 = vpack.c.bf16 %v1024_v48, %v1024_v48  ;;  %v1025_v1 = vsel %vm1001_vm15, %v989_v43, %v1013_v62 }
 0x12c   : > { %v1296_v2 = vpack.c.bf16 %v1025_v1, %v1025_v1 }
 0x12d   : > { %1325 = vst [vmem:[%s1573_s4 + $0x20] sm:$0xff] %v1320_v53   ;;  %1084 = vst [vmem:[%s1573_s4 + $0x28] sm:$0xf] %v1295_v0 }
 0x12e   : > { %1085 = vst [vmem:[%s1573_s4 + $0x2c] sm:$0x1] %v1296_v2 }
 0x12f PF: > { %s13_s16 = sadd.s32 1, %s1509_s16   ;;  %s1702_s12 = smov %s1501_s14 }
 0x130   : > { %p10_p9 = scmp.ge.s32.totalorder %s13_s16, 10   ;;  %s1703_s13 = smov %s1505_s15 }
 0x131   : > { %s1704_s14 = smov %s1707_s17  ;;  %s1705_s15 = smov %s1711_s18 }
 0x132   :  { %12 = sbr.rel (!%p10_p9) target bundleno = 3 (0x3), region = 79 }

</bundles_post_ra>
